<compile_context>
chip_gen: v7x
topology: tpu7x:2x2x1
jax: 0.10.0
libtpu: 0.0.40
codegen_flags: <defaults>
</compile_context>

<pallas_src>
import functools
import math

import jax
import jax.numpy as jnp
from jax.experimental import pallas as pl
from jax.experimental.pallas import tpu as pltpu


_LANE = 128
_MiB = 1024 * 1024


def _round_up(x: int, m: int) -> int:
    return ((x + m - 1) // m) * m


def _cdiv(a: int, b: int) -> int:
    return -(-a // b)


def _detect_vmem_capacity_bytes() -> int:
    """Generation-aware per-TensorCore VMEM capacity."""
    try:
        return int(pltpu.get_tpu_info().vmem_capacity_bytes)
    except Exception:
        pass
    try:
        kind = jax.devices()[0].device_kind.lower()
        if "v7" in kind:
            return 64 * _MiB
        if "v2" in kind or "v3" in kind:
            return 16 * _MiB
        if "v4" in kind or "v5" in kind or "v6" in kind:
            return 128 * _MiB
    except Exception:
        pass
    return 64 * _MiB  # conservative fallback (v7x-safe)


def _fused_mlp_kernel(x_ref, *refs, layer_widths, compute_dtype):
    """Fused L-layer MLP on one (tm, K) row tile.

    refs = (w_0, ..., w_{L-1}, bias_pack, o_ref).
    Weights are (K_i, N_i) in compute_dtype; bias_pack is (L, Npad) f32.
    x is loaded in its HBM dtype and cast to compute_dtype on the VPU.
    """
    o_ref = refs[-1]
    b_ref = refs[-2]
    w_refs = refs[:-2]
    num_layers = len(w_refs)

    h = x_ref[...].astype(compute_dtype)                       # in-kernel cast
    for i in range(num_layers):
        n = layer_widths[i]
        acc = jnp.dot(h, w_refs[i][...], preferred_element_type=jnp.float32)
        acc = acc + b_ref[i:i + 1, :n]                          # f32 bias, broadcast rows
        if i < num_layers - 1:
            h = jnp.maximum(acc, 0.0).astype(compute_dtype)     # ReLU on f32 accumulator
        else:
            o_ref[...] = acc.astype(o_ref.dtype)                # (tm, embed_dim) store


def _choose_tile_m(M, K, embed_dim, n_max, in_itemsize, out_itemsize,
                   compute_itemsize, resident_bytes, budget_bytes):
    """Largest M tile whose resident weights + double-buffered x/out tiles +
    in-kernel temporaries fit the generation-aware VMEM budget."""
    if M <= 32:
        return M  # single exact tile; block dims == full array dims

    def footprint(t):
        io = 2 * t * (K * in_itemsize + embed_dim * out_itemsize)   # double-buffered tiles
        scratch = t * n_max * (2 * 4 + compute_itemsize)            # f32 acc + relu tmp + h
        return 2 * resident_bytes + io + scratch                    # weights double-buffered

    tm = min(1024, _round_up(M, 16))
    while tm > 16 and footprint(tm) > budget_bytes:
        tm = max(16, _round_up(tm // 2, 16))

    # Prefer >= 2 tiles (and an even tile count) so the "parallel" M axis can be
    # sharded across both TensorCores on v7x; harmless on single-TC chips.
    num = _cdiv(M, tm)
    if num == 1:
        tm = max(16, _round_up(_cdiv(M, 2), 16))
        num = _cdiv(M, tm)
    if num > 1 and num % 2 == 1:
        cand = max(16, _round_up(_cdiv(M, num + 1), 16))
        if _cdiv(M, cand) % 2 == 0 and footprint(cand) <= budget_bytes:
            tm = cand
    return tm


def _fused_mlp_forward(x, weights, bias_pack, *, embed_dim, layer_widths,
                       compute_dtype, vmem_budget, vmem_limit):
    lead = x.shape[:-1]
    x2d = x.reshape(-1, x.shape[-1])
    M, K = x2d.shape
    out_dtype = x.dtype
    n_max = bias_pack.shape[-1]

    resident = (sum(w.size * w.dtype.itemsize for w in weights)
                + bias_pack.size * bias_pack.dtype.itemsize)
    # TODO(synk): if the weight set ever exceeds the VMEM budget (very large
    # embed_dim), a K/N-tiled variant is required; this fused kernel assumes
    # full weight residency in VMEM.
    tm = _choose_tile_m(M, K, embed_dim, n_max,
                        jnp.dtype(x.dtype).itemsize,
                        jnp.dtype(out_dtype).itemsize,
                        jnp.dtype(compute_dtype).itemsize,
                        resident, vmem_budget)
    grid = (pl.cdiv(M, tm),)

    # x tile: raw HBM dtype, full K (K == full array dim, so no lane padding needed).
    in_specs = [pl.BlockSpec((tm, K), lambda i: (i, 0))]
    # Weights / packed bias: constant index_map -> fetched once, VMEM-resident
    # across all M tiles.  (The default pipeliner still reserves two buffers for
    # them; the budget accounts for 2x.  pl.Buffered(1) single-buffering would
    # halve that for very large embed_dim on v7x.)
    for w in weights:
        in_specs.append(pl.BlockSpec(w.shape, lambda i: (0, 0)))
    in_specs.append(pl.BlockSpec(bias_pack.shape, lambda i: (0, 0)))

    kernel = functools.partial(_fused_mlp_kernel,
                               layer_widths=layer_widths,
                               compute_dtype=compute_dtype)

    out2d = pl.pallas_call(
        kernel,
        out_shape=jax.ShapeDtypeStruct((M, embed_dim), out_dtype),
        grid=grid,
        in_specs=in_specs,
        out_specs=pl.BlockSpec((tm, embed_dim), lambda i: (i, 0)),
        compiler_params=pltpu.CompilerParams(
            dimension_semantics=("parallel",),   # shard M tiles across TCs (v7x)
            vmem_limit_bytes=vmem_limit,
        ),
    )(x2d, *weights, bias_pack)
    return out2d.reshape(*lead, embed_dim)


class EmbeddingLayerPallas:
    """JAX/Pallas port of Embedding_layer: Linear(in, d) + (L-1) x Linear(d, d),
    ReLU after every layer except the last; the whole MLP is ONE fused kernel."""

    def __init__(self, input_dim: int, embed_dim: int, embed_layer: int,
                 key: jax.Array, dtype=jnp.float32, compute_dtype=jnp.bfloat16):
        assert embed_layer >= 1
        self.input_dim = input_dim
        self.embed_dim = embed_dim
        self.dtype = dtype
        self.compute_dtype = compute_dtype

        dpad = _round_up(embed_dim, _LANE)
        # Per-layer output width used by the kernel: intermediates are lane-padded
        # (they never hit HBM); the FINAL layer stays at embed_dim so the output is
        # written as (M, embed_dim) directly (no post-kernel slice pass).
        layer_widths = tuple([dpad] * (embed_layer - 1) + [embed_dim])

        self.params = []            # unpadded f32 params (PyTorch-equivalent, for reference)
        kernel_weights = []
        bias_rows = []
        in_dim = input_dim
        for li in range(embed_layer):
            fan_in, fan_out = in_dim, embed_dim
            key, kw, kb = jax.random.split(key, 3)
            bound = 1.0 / math.sqrt(fan_in)
            w = jax.random.uniform(kw, (fan_in, fan_out), dtype, -bound, bound)
            b = jax.random.uniform(kb, (1, fan_out), dtype, -bound, bound)
            self.params.append((w, b))

            kp = fan_in if li == 0 else dpad       # layer-0 K stays unpadded (x fed raw)
            np_ = layer_widths[li]
            w_pad = jnp.zeros((kp, np_), compute_dtype).at[:fan_in, :fan_out].set(
                w.astype(compute_dtype))
            kernel_weights.append(w_pad)
            bias_rows.append(jnp.zeros((dpad,), jnp.float32).at[:fan_out].set(
                b[0].astype(jnp.float32)))
            in_dim = embed_dim

        self.kernel_weights = tuple(kernel_weights)
        # All L biases packed into one (L, dpad) f32 operand: fewer DMA descriptors,
        # no per-bias (1, N) -> (8, N) sublane padding per operand.
        self.kernel_bias = jnp.stack(bias_rows, axis=0)

        vmem_cap = _detect_vmem_capacity_bytes()
        self._forward = jax.jit(functools.partial(
            _fused_mlp_forward,
            embed_dim=embed_dim,
            layer_widths=layer_widths,
            compute_dtype=compute_dtype,
            vmem_budget=int(vmem_cap * 0.625),
            vmem_limit=int(vmem_cap * 0.75),
        ))

    def __call__(self, x: jax.Array) -> jax.Array:
        return self._forward(x, self.kernel_weights, self.kernel_bias)


def _reference(x, params, compute_dtype):
    """Pure-JAX reference with the same dtype flow (compute_dtype operands, f32 acc)."""
    lead = x.shape[:-1]
    h = x.reshape(-1, x.shape[-1]).astype(compute_dtype)
    out = None
    for i, (w, b) in enumerate(params):
        acc = jnp.dot(h, w.astype(compute_dtype),
                      preferred_element_type=jnp.float32) + b.astype(jnp.float32)
        if i < len(params) - 1:
            h = jnp.maximum(acc, 0.0).astype(compute_dtype)
        else:
            out = acc.astype(x.dtype)
    return out.reshape(*lead, -1)


if __name__ == "__main__":
    key = jax.random.PRNGKey(0)
    k_x, k_p, k_x2, k_p2, k_x3, k_p3 = jax.random.split(key, 6)

    # Case 1: shapes implied by the module spec (batch=2, seq=8, dims=32, 3 layers).
    batch, seq = 2, 8
    input_dim, embed_dim, embed_layer = 32, 32, 3
    x = jax.random.normal(k_x, (batch, seq, input_dim), jnp.float32)
    model = EmbeddingLayerPallas(input_dim, embed_dim, embed_layer, k_p)
    out = jax.block_until_ready(model(x))
    ref = _reference(x, model.params, model.compute_dtype)
    assert out.shape == (batch, seq, embed_dim), out.shape
    assert jnp.allclose(out, ref, atol=2e-4, rtol=2e-4), "mismatch vs reference (case 1)"

    # Case 2: non-128-aligned feature dims and a non-multiple-of-8 row count (M=15).
    x2 = jax.random.normal(k_x2, (3, 5, 20), jnp.float32)
    model2 = EmbeddingLayerPallas(20, 48, 2, k_p2)
    out2 = jax.block_until_ready(model2(x2))
    ref2 = _reference(x2, model2.params, model2.compute_dtype)
    assert out2.shape == (3, 5, 48), out2.shape
    assert jnp.allclose(out2, ref2, atol=2e-4, rtol=2e-4), "mismatch vs reference (case 2)"

    # Case 3: full-f32 compute path (PyTorch-default precision) with a larger M that
    # exercises the multi-tile grid + partial trailing block (M=68, 2 tiles of 48).
    x3 = jax.random.normal(k_x3, (4, 17, 32), jnp.float32)
    model3 = EmbeddingLayerPallas(32, 32, 2, k_p3, compute_dtype=jnp.float32)
    out3 = jax.block_until_ready(model3(x3))
    ref3 = _reference(x3, model3.params, jnp.float32)
    assert out3.shape == (4, 17, 32), out3.shape
    assert jnp.allclose(out3, ref3, atol=1e-2, rtol=1e-2), "mismatch vs reference (case 3)"

    print("KERNEL_OK")
</pallas_src>

<mosaic_0001>
module attributes {stable_mosaic.version = 11 : i64} {
  func.func @_fused_mlp_kernel(%arg0: i32, %arg1: memref<16x32xf32, #tpu.memory_space<vmem>>, %arg2: memref<32x128xbf16, #tpu.memory_space<vmem>>, %arg3: memref<128x128xbf16, #tpu.memory_space<vmem>>, %arg4: memref<128x32xbf16, #tpu.memory_space<vmem>>, %arg5: memref<3x128xf32, #tpu.memory_space<vmem>>, %arg6: memref<16x32xf32, #tpu.memory_space<vmem>>) attributes {dimension_semantics = [#tpu.dimension_semantics<parallel>], iteration_bounds = array<i64: 1>, scalar_prefetch = 0 : i64, scratch_operands = 0 : i64, tpu.core_type = #tpu.core_type<tc>, window_params = [{transform_indices = @transform_0, window_bounds = array<i64: 16, 32>}, {pipeline_mode = #tpu.pipeline_mode<synchronous>, transform_indices = @transform_1, window_bounds = array<i64: 32, 128>}, {pipeline_mode = #tpu.pipeline_mode<synchronous>, transform_indices = @transform_2, window_bounds = array<i64: 128, 128>}, {pipeline_mode = #tpu.pipeline_mode<synchronous>, transform_indices = @transform_3, window_bounds = array<i64: 128, 32>}, {pipeline_mode = #tpu.pipeline_mode<synchronous>, transform_indices = @transform_4, window_bounds = array<i64: 3, 128>}, {transform_indices = @transform_5, window_bounds = array<i64: 16, 32>}]} {
    %c0 = arith.constant 0 : index
    %c0_0 = arith.constant 0 : index
    %0 = vector.load %arg1[%c0, %c0_0] : memref<16x32xf32, #tpu.memory_space<vmem>>, vector<16x32xf32>
    %1 = arith.truncf %0 : vector<16x32xf32> to vector<16x32xbf16>
    %c0_1 = arith.constant 0 : index
    %c0_2 = arith.constant 0 : index
    %2 = vector.load %arg2[%c0_1, %c0_2] : memref<32x128xbf16, #tpu.memory_space<vmem>>, vector<32x128xbf16>
    %cst = arith.constant dense<0.000000e+00> : vector<16x128xf32>
    %3 = tpu.matmul %1, %2, %cst {dimension_numbers = #tpu.dot_dimension_numbers<[1], [0], [0], [1], [0, 0, 1, 1], [], []>} : vector<16x32xbf16>, vector<32x128xbf16>, vector<16x128xf32> -> vector<16x128xf32>
    %c0_3 = arith.constant 0 : index
    %c0_4 = arith.constant 0 : index
    %4 = vector.load %arg5[%c0_3, %c0_4] : memref<3x128xf32, #tpu.memory_space<vmem>>, vector<1x128xf32>
    %5 = vector.broadcast %4 : vector<1x128xf32> to vector<16x128xf32>
    %6 = arith.addf %3, %5 : vector<16x128xf32>
    %cst_5 = arith.constant 0.000000e+00 : f32
    %7 = vector.broadcast %cst_5 : f32 to vector<16x128xf32>
    %8 = arith.maximumf %6, %7 : vector<16x128xf32>
    %9 = arith.truncf %8 : vector<16x128xf32> to vector<16x128xbf16>
    %c0_6 = arith.constant 0 : index
    %c0_7 = arith.constant 0 : index
    %10 = vector.load %arg3[%c0_6, %c0_7] : memref<128x128xbf16, #tpu.memory_space<vmem>>, vector<128x128xbf16>
    %cst_8 = arith.constant dense<0.000000e+00> : vector<16x128xf32>
    %11 = tpu.matmul %9, %10, %cst_8 {dimension_numbers = #tpu.dot_dimension_numbers<[1], [0], [0], [1], [0, 0, 1, 1], [], []>} : vector<16x128xbf16>, vector<128x128xbf16>, vector<16x128xf32> -> vector<16x128xf32>
    %c1 = arith.constant 1 : index
    %c0_9 = arith.constant 0 : index
    %12 = vector.load %arg5[%c1, %c0_9] : memref<3x128xf32, #tpu.memory_space<vmem>>, vector<1x128xf32>
    %13 = vector.broadcast %12 : vector<1x128xf32> to vector<16x128xf32>
    %14 = arith.addf %11, %13 : vector<16x128xf32>
    %cst_10 = arith.constant 0.000000e+00 : f32
    %15 = vector.broadcast %cst_10 : f32 to vector<16x128xf32>
    %16 = arith.maximumf %14, %15 : vector<16x128xf32>
    %17 = arith.truncf %16 : vector<16x128xf32> to vector<16x128xbf16>
    %c0_11 = arith.constant 0 : index
    %c0_12 = arith.constant 0 : index
    %18 = vector.load %arg4[%c0_11, %c0_12] : memref<128x32xbf16, #tpu.memory_space<vmem>>, vector<128x32xbf16>
    %cst_13 = arith.constant dense<0.000000e+00> : vector<16x32xf32>
    %19 = tpu.matmul %17, %18, %cst_13 {dimension_numbers = #tpu.dot_dimension_numbers<[1], [0], [0], [1], [0, 0, 1, 1], [], []>} : vector<16x128xbf16>, vector<128x32xbf16>, vector<16x32xf32> -> vector<16x32xf32>
    %c2 = arith.constant 2 : index
    %c0_14 = arith.constant 0 : index
    %20 = vector.load %arg5[%c2, %c0_14] : memref<3x128xf32, #tpu.memory_space<vmem>>, vector<1x32xf32>
    %21 = vector.broadcast %20 : vector<1x32xf32> to vector<16x32xf32>
    %22 = arith.addf %19, %21 : vector<16x32xf32>
    %c0_15 = arith.constant 0 : index
    %c0_16 = arith.constant 0 : index
    %23 = vector.load %arg6[%c0_15, %c0_16] : memref<16x32xf32, #tpu.memory_space<vmem>>, vector<16x32xf32>
    tpu.vector_store %arg6[%c0_15, %c0_16], %22 {strides = array<i32>} : memref<16x32xf32, #tpu.memory_space<vmem>>, vector<16x32xf32>,
    return
  }
  func.func @transform_0(%arg0: i32) -> (i32, i32) {
    %c0_i32 = arith.constant 0 : i32
    %c0_i32_0 = arith.constant 0 : i32
    return %arg0, %c0_i32 : i32, i32
  }
  func.func @transform_1(%arg0: i32) -> (i32, i32) {
    %c0_i32 = arith.constant 0 : i32
    %c0_i32_0 = arith.constant 0 : i32
    %c0_i32_1 = arith.constant 0 : i32
    return %c0_i32, %c0_i32_0 : i32, i32
  }
  func.func @transform_2(%arg0: i32) -> (i32, i32) {
    %c0_i32 = arith.constant 0 : i32
    %c0_i32_0 = arith.constant 0 : i32
    %c0_i32_1 = arith.constant 0 : i32
    return %c0_i32, %c0_i32_0 : i32, i32
  }
  func.func @transform_3(%arg0: i32) -> (i32, i32) {
    %c0_i32 = arith.constant 0 : i32
    %c0_i32_0 = arith.constant 0 : i32
    %c0_i32_1 = arith.constant 0 : i32
    return %c0_i32, %c0_i32_0 : i32, i32
  }
  func.func @transform_4(%arg0: i32) -> (i32, i32) {
    %c0_i32 = arith.constant 0 : i32
    %c0_i32_0 = arith.constant 0 : i32
    %c0_i32_1 = arith.constant 0 : i32
    return %c0_i32, %c0_i32_0 : i32, i32
  }
  func.func @transform_5(%arg0: i32) -> (i32, i32) {
    %c0_i32 = arith.constant 0 : i32
    %c0_i32_0 = arith.constant 0 : i32
    return %arg0, %c0_i32 : i32, i32
  }
}

</mosaic_0001>

<bundles_post_ra>
// kernel: _fused_mlp_forward.1
= control target key start
LH: loop header
LB: loop body
LE: loop exit
PB: predicated region body
PF: predicated region fallthrough
CT: control target
= control target key end

     0   :  { %10 = vsyncpa [#allocation3], 0  ;;  %s667_s0 = inlined_call_operand.vmem [shape: f32[16,32], index: 0, kind: input, shape index: {}]   ;;  %s668_s1 = inlined_call_operand.hbm [shape: bf16[32,128], index: 1, kind: input, shape index: {}]   ;;  %s669_s2 = inlined_call_operand.vmem [shape: bf16[128,128], index: 2, kind: input, shape index: {}]   ;;  %s670_s3 = inlined_call_operand.vmem [shape: bf16[128,32], index: 3, kind: input, shape index: {}]   ;;  %s671_s4 = inlined_call_operand.vmem [shape: f32[3,128], index: 4, kind: input, shape index: {}]   ;;  %s672_s5 = inlined_call_operand.hbm [shape: f32[16,32], index: 5, kind: output, shape index: {}]  }
   0x1   :  { %11 = vsyncpa [#allocation4], 0  ;;  %s515_s18 = smov [#allocation2]   ;;  %s467_s22 = scalar_lea.hbm %s668_s1, 256 }
   0x2   :  { %s19_s19 = sshll.u32 %s515_s18, 4  ;;  %p468_p0 = scmp.ne.s32.totalorder %s668_s1, %s467_s22  ;;  %s20_s19 = int_to_ptr.vmem [resolvable:$true] %s19_s19 }
   0x3   :  { %p471_p1 = scmp.lt.u32.totalorder %s467_s22, %s668_s1 }
   0x5   :  { %p473_p2 = pnand %p471_p1, %p468_p0 }
   0x7   :  { %476 = shalt.err (!%p473_p2)
}
   0x8   :  { %s477_s27 = scalar_lea.vmem %s20_s19, 256  ;;  %p482_p4 = scmp.lt.s32.totalorder %s20_s19, %s20_s19 }
   0x9   :  { %p478_p3 = scmp.ne.s32.totalorder %s20_s19, %s477_s27  ;;  %p483_p5 = scmp.lt.s32.totalorder %s477_s27, %s477_s27 }
   0xb   :  { %p484_p6 = por %p483_p5, %p482_p4 }
   0xd   :  { %p485_p7 = pnand %p484_p6, %p478_p3 }
   0xf   :  { %488 = shalt.err (!%p485_p7)
}
  0x10   :  { %s516_s28 = smov 64   ;;  %s517_s29 = smov 4  }
  0x11   :  { %25 = dma.hbm_to_vmem [thread:$0]  %s668_s1, 256, %s20_s19, [#allocation3], %s516_s28, %s516_s28, %s517_s29  }
  0x12   :  { %511 = dma.done.wait [#allocation3], 256  }
  0x13   :  { %512 = vsyncadd [#allocation3], 4294967040  ;;  %v518_v0 = vmov 0.0   ;;  %vm519_vm0 = vmmov 0   ;;  %v449_v1 = vld [vmem:[#allocation2] sm:$0xff]   ;;  %v450_v2 = vld [vmem:[#allocation2 + $0x8] sm:$0xff]  }
  0x14   :  { %393 = vmatprep.subr.bf16.mxu0 %v518_v0  ;;  %397 = vmatprep.mubr.msk.bf16.mxu0 %vm519_vm0, %v518_v0  ;;  %v36_v3 = vld [vmem:[%s667_s0] sm:$0xff]  ;;  %v37_v4 = vld [vmem:[%s667_s0 + $0x8] sm:$0xff]  ;;  %vm60_vm1 = vcmask 261120   ;;  %v453_v8 = vld [vmem:[%s669_s2 + $0x10] sm:$0xff]  }
  0x15   :  { %401 = vmatprep.subr.bf16.mxu1 %v518_v0  ;;  %417 = vmatprep.mubr.msk.bf16.mxu1 %vm519_vm0, %v518_v0  ;;  %v451_v5 = vld [vmem:[%s669_s2] sm:$0xff]   ;;  %v38_v6 = vpack.c.bf16 %v37_v4, %v36_v3  ;;  %v452_v7 = vld [vmem:[%s669_s2 + $0x8] sm:$0xff]   ;;  %v454_v9 = vld [vmem:[%s669_s2 + $0x18] sm:$0xff]  }
  0x16   :  { %394 = vmatpush3.bf16.msra.mxu0 %v449_v1  ;;  %402 = vmatpush3.bf16.msra.mxu1 %v451_v5  ;;  %v455_v10 = vld [vmem:[%s669_s2 + $0x20] sm:$0xff]   ;;  %v456_v11 = vld [vmem:[%s669_s2 + $0x28] sm:$0xff]   ;;  %v457_v12 = vld [vmem:[%s669_s2 + $0x30] sm:$0xff]  }
  0x17   :  { %395 = vmatprep.subr.bf16.mxu0 %v518_v0  ;;  %403 = vmatprep.subr.bf16.mxu1 %v518_v0  ;;  %v458_v13 = vld [vmem:[%s669_s2 + $0x38] sm:$0xff]   ;;  %v459_v14 = vld [vmem:[%s670_s3] sm:$0xff]   ;;  %v460_v15 = vld [vmem:[%s670_s3 + $0x8] sm:$0xff]  }
  0x18   :  { %v461_v16 = vld [vmem:[%s670_s3 + $0x10] sm:$0xff]   ;;  %v462_v17 = vld [vmem:[%s670_s3 + $0x18] sm:$0xff]   ;;  %v463_v18 = vld [vmem:[%s670_s3 + $0x20] sm:$0xff]  }
  0x19   :  { %v464_v19 = vld [vmem:[%s670_s3 + $0x28] sm:$0xff]   ;;  %v350_v20 = vld [vmem:[%s671_s4] ss:$0 sm:$0xff]  ;;  %v465_v30 = vld [vmem:[%s670_s3 + $0x30] sm:$0xff]  }
  0x1a   :  { %396 = vmatpush3.bf16.msra.mxu0 %v450_v2  ;;  %404 = vmatpush3.bf16.msra.mxu1 %v452_v7  ;;  %v466_v31 = vld [vmem:[%s670_s3 + $0x38] sm:$0xff]   ;;  %v354_v32 = vld [vmem:[%s671_s4 + $0x1] ss:$0 sm:$0xff]  ;;  %v363_v42 = vld [vmem:[%s671_s4 + $0x2] ss:$0 sm:$0xff]  ;;  %s520_s3 = smov [#allocation5]  }
  0x1b   :  { %421 = vmatprep.subr.bf16.mxu0 %v518_v0  ;;  %405 = vmatprep.subr.bf16.mxu1 %v518_v0  ;;  %s338_s19 = sshll.u32 %s520_s3, 4  ;;  %s339_s19 = int_to_ptr.vmem [resolvable:$true] %s338_s19 }
  0x1c   :  { %s489_s20 = scalar_lea.vmem %s339_s19, 256  ;;  %p494_p9 = scmp.lt.s32.totalorder %s339_s19, %s339_s19 }
  0x1d   :  { %398 = vmatmul.mubr.msk.bf16.vlgmr.msra.gmra.mrb[0].mxu0 %vm60_vm1, %v38_v6  ;;  %p490_p8 = scmp.ne.s32.totalorder %s339_s19, %s489_s20  ;;  %p495_p10 = scmp.lt.s32.totalorder %s489_s20, %s489_s20 }
  0x1e   :  { %437 = vmatprep.mubr.msk.bf16.mxu0 %vm519_vm0, %v518_v0  ;;  %406 = vmatpush3.bf16.msra.mxu1 %v453_v8 }
  0x1f   :  { %407 = vmatprep.subr.bf16.mxu1 %v518_v0  ;;  %422 = vmatpush3.bf16.msra.mxu0 %v459_v14  ;;  %p496_p11 = por %p495_p10, %p494_p9 }
  0x20   :  { %423 = vmatprep.subr.bf16.mxu0 %v518_v0 }
  0x21   :  { %p497_p12 = pnand %p496_p11, %p490_p8 }
  0x22   :  { %408 = vmatpush3.bf16.msra.mxu1 %v454_v9 }
  0x23   :  { %409 = vmatprep.subr.bf16.mxu1 %v518_v0  ;;  %424 = vmatpush3.bf16.msra.mxu0 %v460_v15 }
  0x24   :  { %425 = vmatprep.subr.bf16.mxu0 %v518_v0 }
  0x26   :  { %410 = vmatpush3.bf16.msra.mxu1 %v455_v10 }
  0x27   :  { %411 = vmatprep.subr.bf16.mxu1 %v518_v0  ;;  %426 = vmatpush3.bf16.msra.mxu0 %v461_v16 }
  0x28   :  { %427 = vmatprep.subr.bf16.mxu0 %v518_v0 }
  0x2a   :  { %412 = vmatpush3.bf16.msra.mxu1 %v456_v11 }
  0x2b   :  { %413 = vmatprep.subr.bf16.mxu1 %v518_v0  ;;  %428 = vmatpush3.bf16.msra.mxu0 %v462_v17 }
  0x2c   :  { %429 = vmatprep.subr.bf16.mxu0 %v518_v0 }
  0x2e   :  { %414 = vmatpush3.bf16.msra.mxu1 %v457_v12 }
  0x2f   :  { %415 = vmatprep.subr.bf16.mxu1 %v518_v0  ;;  %430 = vmatpush3.bf16.msra.mxu0 %v463_v18 }
  0x30   :  { %431 = vmatprep.subr.bf16.mxu0 %v518_v0 }
  0x32   :  { %416 = vmatpush3.bf16.msra.mxu1 %v458_v13 }
  0x33   :  { %432 = vmatpush3.bf16.msra.mxu0 %v464_v19 }
  0x34   :  { %433 = vmatprep.subr.bf16.mxu0 %v518_v0 }
  0x37   :  { %434 = vmatpush3.bf16.msra.mxu0 %v465_v30 }
  0x38   :  { %435 = vmatprep.subr.bf16.mxu0 %v518_v0 }
  0x3b   :  { %436 = vmatpush3.bf16.msra.mxu0 %v466_v31 }
  0xf0   :  { %v98_v21 = vpop.f32.mrb[0].mxu0 }
  0xf1   :  { %v99_v22 = vadd.f32 %v350_v20, %v98_v21  ;;  %v399_v23 = vpop.f32.mrb[1].mxu0 }
  0xf2   :  { %v101_v24 = vpop.f32.mrb[2].mxu0 }
  0xf3   :  { %v102_v25 = vadd.f32 %v350_v20, %v101_v24  ;;  %v400_v26 = vpop.f32.mrb[3].mxu0  ;;  %v105_v27 = vmax.f32 %v99_v22, 0.0 }
  0xf5   :  { %v106_v28 = vmax.f32 %v102_v25, 0.0 }
  0xf7   :  { %v107_v29 = vpack.c.bf16 %v106_v28, %v105_v27 }
  0xf9   :  { %418 = vmatmul.mubr.bf16.vlgmr.msra.gmra.mrb[0].mxu1 %v107_v29 }
 0x1cc   :  { %v211_v33 = vpop.f32.mrb[0].mxu1 }
 0x1cd   :  { %v212_v34 = vadd.f32 %v354_v32, %v211_v33  ;;  %v419_v35 = vpop.f32.mrb[1].mxu1 }
 0x1ce   :  { %v214_v36 = vpop.f32.mrb[2].mxu1 }
 0x1cf   :  { %v215_v37 = vadd.f32 %v354_v32, %v214_v36  ;;  %v420_v38 = vpop.f32.mrb[3].mxu1  ;;  %v218_v39 = vmax.f32 %v212_v34, 0.0 }
 0x1d1   :  { %v219_v40 = vmax.f32 %v215_v37, 0.0 }
 0x1d3   :  { %v220_v41 = vpack.c.bf16 %v219_v40, %v218_v39 }
 0x1d5   :  { %438 = vmatmul.mubr.bf16.vlgmr.msra.gmra.mrb[4].mxu0 %v220_v41 }
 0x2a8   :  { %v324_v43 = vpop.f32.mrb[4].mxu0 }
 0x2a9   :  { %v325_v44 = vadd.f32 %v363_v42, %v324_v43  ;;  %v439_v45 = vpop.f32.mrb[5].mxu0 }
 0x2aa   :  { %v327_v46 = vpop.f32.mrb[6].mxu0 }
 0x2ab   :  { %331 = vst.msk [vmem:[#allocation5] sm:$0xff] %vm60_vm1, %v325_v44  ;;  %v328_v47 = vadd.f32 %v363_v42, %v327_v46  ;;  %v440_v48 = vpop.f32.mrb[7].mxu0 }
 0x2ad   :  { %332 = vst.msk [vmem:[#allocation5 + $0x8] sm:$0xff] %vm60_vm1, %v328_v47 }
 0x2ae   :  { %500 = shalt.err (!%p497_p12)
}
 0x2af   :  { %s501_s22 = scalar_lea.hbm %s672_s5, 256 }
 0x2b0   :  { %p502_p13 = scmp.ne.s32.totalorder %s672_s5, %s501_s22  ;;  %p505_p0 = scmp.lt.u32.totalorder %s501_s22, %s672_s5 }
 0x2b2   :  { %p507_p1 = pnand %p505_p0, %p502_p13 }
 0x2b4   :  { %510 = shalt.err (!%p507_p1)
}
 0x2b5   :  { %s521_s27 = smov 128   ;;  %s522_s28 = smov 8  }
 0x2b6   :  { %344 = dma.vmem_to_hbm [thread:$0]  %s339_s19, 256, %s672_s5, [#allocation4], %s521_s27, %s521_s27, %s522_s28  }
 0x2b7   :  { %513 = dma.done.wait [#allocation4], 256  }
 0x2b8   :  { %514 = vsyncadd [#allocation4], 4294967040 }
 0x2b9   :  { %348 = vsyncpa [#allocation3], 1 }
 0x2ba   :  { %349 = vsyncpa [#allocation4], 1 }

</bundles_post_ra>
